<compile_context>
chip_gen: v7x
topology: tpu7x:2x2x1
jax: 0.10.0
libtpu: 0.0.40
codegen_flags: <defaults>
</compile_context>

<pallas_src>
import jax
import jax.numpy as jnp
from jax.experimental import pallas as pl
from jax.experimental.pallas import tpu as pltpu

_SQRT_2_OVER_PI = 0.7978845608028654  # sqrt(2/pi)
_GELU_C = 0.044715


def _round_up(x, m):
    return (x + m - 1) // m * m


def _pad2d(a, rows, cols):
    pr = rows - a.shape[0]
    pc = cols - a.shape[1]
    if pr or pc:
        a = jnp.pad(a, ((0, pr), (0, pc)))
    return a


def _gelu_tanh(h):
    # GELU(approximate='tanh') in f32; h*h reused, tanh runs on the EUP slot.
    hh = h * h
    inner = _SQRT_2_OVER_PI * h * (1.0 + _GELU_C * hh)
    return h * (0.5 + 0.5 * jnp.tanh(inner))


def _mlp_kernel_single(x_ref, w1_ref, b1_ref, w2_ref, b2_ref, o_ref):
    """Whole hidden dim fits one tile: no accumulator scratch needed."""
    x = x_ref[...].astype(w1_ref.dtype)
    h = jnp.dot(x, w1_ref[...], preferred_element_type=jnp.float32) + b1_ref[...]
    g = _gelu_tanh(h)
    o_ref[...] = (jnp.dot(g.astype(w2_ref.dtype), w2_ref[...],
                          preferred_element_type=jnp.float32)
                  + b2_ref[...]).astype(o_ref.dtype)


def _mlp_kernel_multi(x_ref, w1_ref, b1_ref, w2_ref, b2_ref, o_ref, acc_ref):
    """Hidden dim tiled as reduction axis k; f32 accumulator in VMEM scratch.

    First step writes acc (no zero-init read), middle steps accumulate, last
    step writes o_ref directly (acc + part + b2) without touching acc again.
    """
    k = pl.program_id(1)
    nk = pl.num_programs(1)

    x = x_ref[...].astype(w1_ref.dtype)
    h = jnp.dot(x, w1_ref[...], preferred_element_type=jnp.float32) + b1_ref[...]
    g = _gelu_tanh(h)
    part = jnp.dot(g.astype(w2_ref.dtype), w2_ref[...],
                   preferred_element_type=jnp.float32)

    @pl.when(k == 0)
    def _():
        acc_ref[...] = part

    @pl.when(jnp.logical_and(k > 0, k < nk - 1))
    def _():
        acc_ref[...] += part

    @pl.when(k == nk - 1)
    def _():
        o_ref[...] = (acc_ref[...] + part + b2_ref[...]).astype(o_ref.dtype)


def _vmem_capacity_bytes():
    try:
        return int(pltpu.get_tpu_info().vmem_capacity_bytes)
    except Exception:
        return 64 * 1024 * 1024  # conservative (v7x-sized) fallback


def _pick_tm(tm, Mp8, Cp, th, x_itemsize, out_itemsize, num_k, vmem_cap, wbuf):
    """Largest row tile that fits a VMEM budget; >=2 row tiles when possible."""
    budget = int(vmem_cap * 0.6)                      # leave headroom for Mosaic scratch
    weight_bytes = wbuf * 2 * (Cp * th * 2)           # W1 + W2 tiles (bf16), wbuf buffers each
    per_row_bytes = Cp * (2 * x_itemsize + 2 * out_itemsize
                          + (4 if num_k > 1 else 0))  # x, out (double-buffered), f32 acc
    tm_cap = max(8, (budget - weight_bytes) // per_row_bytes // 8 * 8)
    tm_eff = max(8, min(tm, tm_cap, Mp8))
    # Megacore (v7x): make sure the parallel row axis has >= 2 steps.
    if Mp8 > 8 and Mp8 // tm_eff < 2:
        tm_eff = _round_up(pl.cdiv(Mp8, 2), 8)
    return tm_eff


def prepare_mlp_params(w1, b1, w2, b2, *, th=512, compute_dtype=jnp.bfloat16):
    """One-time (per layer) cast + lane-dense zero-padding of the weights.

    w1: (C, H) = c_fc.weight.T,   b1: (H,)
    w2: (H, C) = c_proj.weight.T, b2: (C,)
    """
    C, H = w1.shape
    Cp = _round_up(C, 128)
    th_eff = min(th, _round_up(H, 128))
    assert th_eff % 128 == 0
    Hp = _round_up(H, th_eff)  # hidden tiles divide evenly
    return dict(
        w1=_pad2d(w1, Cp, Hp).astype(compute_dtype),
        b1=_pad2d(b1.reshape(1, H), 1, Hp).astype(jnp.float32),
        w2=_pad2d(w2, Hp, Cp).astype(compute_dtype),
        b2=_pad2d(b2.reshape(1, C), 1, Cp).astype(jnp.float32),
        C=C, H=H, Cp=Cp, Hp=Hp, th=th_eff,
    )


def mlp_pallas(x, params, *, tm=1024):
    """MLP forward: GELU_tanh(x @ W1 + b1) @ W2 + b2 with x of shape (B, T, C)."""
    B, T, C = x.shape
    assert C == params["C"]
    Cp, Hp, th, H = params["Cp"], params["Hp"], params["th"], params["H"]
    out_dtype = x.dtype
    M = B * T

    x_itemsize = x.dtype.itemsize
    out_itemsize = jnp.dtype(out_dtype).itemsize
    num_k = Hp // th
    wbuf = 3 if num_k >= 3 else 2

    vmem_cap = _vmem_capacity_bytes()
    Mp8 = _round_up(M, 8)
    tm_eff = _pick_tm(tm, Mp8, Cp, th, x_itemsize, out_itemsize,
                      num_k, vmem_cap, wbuf)
    Mp = _round_up(Mp8, tm_eff)  # pad rows so no block hangs off the array

    # x keeps its original dtype (cast to bf16 inside the kernel); zero row/col
    # padding is exact and padded rows/cols are sliced off at the end.
    xp = _pad2d(x.reshape(M, C), Mp, Cp)

    grid = (Mp // tm_eff, num_k)
    g0 = grid[0]

    w_mode = {"pipeline_mode": pl.Buffered(3)} if num_k >= 3 else {}
    in_specs = [
        pl.BlockSpec((tm_eff, Cp), lambda i, k: (i, 0)),            # x rows
        pl.BlockSpec((Cp, th), lambda i, k: (0, k), **w_mode),      # W1 tile
        pl.BlockSpec((1, th), lambda i, k: (0, k)),                 # b1 tile
        pl.BlockSpec((th, Cp), lambda i, k: (k, 0), **w_mode),      # W2 tile
        pl.BlockSpec((1, Cp), lambda i, k: (0, 0)),                 # b2
    ]
    out_spec = pl.BlockSpec((tm_eff, Cp), lambda i, k: (i, 0))

    if num_k == 1:
        kernel = _mlp_kernel_single
        scratch = []
    else:
        kernel = _mlp_kernel_multi
        scratch = [pltpu.VMEM((tm_eff, Cp), jnp.float32)]

    # Weights (and b1) are re-streamed once per row tile; x read once, out written once.
    bytes_accessed = (Mp * Cp * x_itemsize
                      + g0 * 2 * (Cp * Hp) * 2        # W1 + W2 bf16 tiles per row tile
                      + g0 * Hp * 4 + Cp * 4          # b1 per row tile, b2 once
                      + Mp * Cp * out_itemsize)
    cost = pl.CostEstimate(flops=4 * Mp * Cp * Hp,
                           transcendentals=Mp * Hp,
                           bytes_accessed=int(bytes_accessed))

    vmem_limit = max(32 << 20, min(vmem_cap - (16 << 20), 96 << 20))

    out = pl.pallas_call(
        kernel,
        out_shape=jax.ShapeDtypeStruct((Mp, Cp), out_dtype),
        grid_spec=pltpu.PrefetchScalarGridSpec(
            num_scalar_prefetch=0,
            grid=grid,
            in_specs=in_specs,
            out_specs=out_spec,
            scratch_shapes=scratch,
        ),
        compiler_params=pltpu.CompilerParams(
            dimension_semantics=("parallel", "arbitrary"),
            vmem_limit_bytes=int(vmem_limit),
        ),
        cost_estimate=cost,
    )(xp, params["w1"], params["b1"], params["w2"], params["b2"])

    return out[:M, :C].reshape(B, T, C)


if __name__ == "__main__":
    # Small config consistent with the module: n_embd=32, hidden=4*32=128.
    B, T, C = 2, 8, 32
    H = 4 * C

    key = jax.random.PRNGKey(0)
    kx, k1, kb1, k2, kb2 = jax.random.split(key, 5)

    x = jax.random.normal(kx, (B, T, C), dtype=jnp.float32)
    # nn.Linear weights: c_fc.weight (H, C), c_proj.weight (C, H) — stored
    # transposed so the kernel computes plain x @ W (== x @ weight.T + b).
    w1 = jax.random.normal(k1, (C, H), dtype=jnp.float32) * 0.02
    b1 = jax.random.normal(kb1, (H,), dtype=jnp.float32) * 0.02
    w2 = jax.random.normal(k2, (H, C), dtype=jnp.float32) * 0.02
    b2 = jax.random.normal(kb2, (C,), dtype=jnp.float32) * 0.02

    params = prepare_mlp_params(w1, b1, w2, b2)
    out = mlp_pallas(x, params)
    jax.block_until_ready(out)

    # Reference mirroring kernel numerics (bf16 matmul inputs, f32 accum + f32 GELU).
    xb = x.reshape(-1, C).astype(jnp.bfloat16)
    hb = jnp.dot(xb, w1.astype(jnp.bfloat16),
                 preferred_element_type=jnp.float32) + b1
    gb = _gelu_tanh(hb)
    ob = jnp.dot(gb.astype(jnp.bfloat16), w2.astype(jnp.bfloat16),
                 preferred_element_type=jnp.float32) + b2
    ref = ob.reshape(B, T, C).astype(x.dtype)

    assert jnp.allclose(out, ref, atol=1e-4, rtol=1e-4), "mismatch vs reference"

    print("KERNEL_OK")
</pallas_src>

<mosaic_0001>
module attributes {stable_mosaic.version = 11 : i64} {
  func.func @_mlp_kernel_single(%arg0: i32, %arg1: i32, %arg2: memref<8x128xf32, #tpu.memory_space<vmem>>, %arg3: memref<128x128xbf16, #tpu.memory_space<vmem>>, %arg4: memref<1x128xf32, #tpu.memory_space<vmem>>, %arg5: memref<128x128xbf16, #tpu.memory_space<vmem>>, %arg6: memref<1x128xf32, #tpu.memory_space<vmem>>, %arg7: memref<8x128xf32, #tpu.memory_space<vmem>>) attributes {dimension_semantics = [#tpu.dimension_semantics<parallel>, #tpu.dimension_semantics<arbitrary>], iteration_bounds = array<i64: 2, 1>, scalar_prefetch = 0 : i64, scratch_operands = 0 : i64, tpu.core_type = #tpu.core_type<tc>, window_params = [{transform_indices = @transform_0, window_bounds = array<i64: 8, 128>}, {transform_indices = @transform_1, window_bounds = array<i64: 128, 128>}, {transform_indices = @transform_2, window_bounds = array<i64: 1, 128>}, {transform_indices = @transform_3, window_bounds = array<i64: 128, 128>}, {pipeline_mode = #tpu.pipeline_mode<synchronous>, transform_indices = @transform_4, window_bounds = array<i64: 1, 128>}, {transform_indices = @transform_5, window_bounds = array<i64: 8, 128>}]} {
    %c0 = arith.constant 0 : index
    %c0_0 = arith.constant 0 : index
    %0 = vector.load %arg2[%c0, %c0_0] : memref<8x128xf32, #tpu.memory_space<vmem>>, vector<8x128xf32>
    %1 = arith.truncf %0 : vector<8x128xf32> to vector<8x128xbf16>
    %c0_1 = arith.constant 0 : index
    %c0_2 = arith.constant 0 : index
    %2 = vector.load %arg3[%c0_1, %c0_2] : memref<128x128xbf16, #tpu.memory_space<vmem>>, vector<128x128xbf16>
    %cst = arith.constant dense<0.000000e+00> : vector<8x128xf32>
    %3 = tpu.matmul %1, %2, %cst {dimension_numbers = #tpu.dot_dimension_numbers<[1], [0], [0], [1], [0, 0, 1, 1], [], []>} : vector<8x128xbf16>, vector<128x128xbf16>, vector<8x128xf32> -> vector<8x128xf32>
    %c0_3 = arith.constant 0 : index
    %c0_4 = arith.constant 0 : index
    %4 = vector.load %arg4[%c0_3, %c0_4] : memref<1x128xf32, #tpu.memory_space<vmem>>, vector<1x128xf32>
    %5 = vector.broadcast %4 : vector<1x128xf32> to vector<8x128xf32>
    %6 = arith.addf %3, %5 : vector<8x128xf32>
    %7 = arith.mulf %6, %6 : vector<8x128xf32>
    %cst_5 = arith.constant 0.797884583 : f32
    %8 = vector.broadcast %cst_5 : f32 to vector<8x128xf32>
    %9 = arith.mulf %8, %6 : vector<8x128xf32>
    %cst_6 = arith.constant 4.471500e-02 : f32
    %10 = vector.broadcast %cst_6 : f32 to vector<8x128xf32>
    %11 = arith.mulf %10, %7 : vector<8x128xf32>
    %cst_7 = arith.constant 1.000000e+00 : f32
    %12 = vector.broadcast %cst_7 : f32 to vector<8x128xf32>
    %13 = arith.addf %12, %11 : vector<8x128xf32>
    %14 = arith.mulf %9, %13 : vector<8x128xf32>
    %15 = math.tanh %14 : vector<8x128xf32>
    %cst_8 = arith.constant 5.000000e-01 : f32
    %16 = vector.broadcast %cst_8 : f32 to vector<8x128xf32>
    %17 = arith.mulf %16, %15 : vector<8x128xf32>
    %cst_9 = arith.constant 5.000000e-01 : f32
    %18 = vector.broadcast %cst_9 : f32 to vector<8x128xf32>
    %19 = arith.addf %18, %17 : vector<8x128xf32>
    %20 = arith.mulf %6, %19 : vector<8x128xf32>
    %21 = arith.truncf %20 : vector<8x128xf32> to vector<8x128xbf16>
    %c0_10 = arith.constant 0 : index
    %c0_11 = arith.constant 0 : index
    %22 = vector.load %arg5[%c0_10, %c0_11] : memref<128x128xbf16, #tpu.memory_space<vmem>>, vector<128x128xbf16>
    %cst_12 = arith.constant dense<0.000000e+00> : vector<8x128xf32>
    %23 = tpu.matmul %21, %22, %cst_12 {dimension_numbers = #tpu.dot_dimension_numbers<[1], [0], [0], [1], [0, 0, 1, 1], [], []>} : vector<8x128xbf16>, vector<128x128xbf16>, vector<8x128xf32> -> vector<8x128xf32>
    %c0_13 = arith.constant 0 : index
    %c0_14 = arith.constant 0 : index
    %24 = vector.load %arg6[%c0_13, %c0_14] : memref<1x128xf32, #tpu.memory_space<vmem>>, vector<1x128xf32>
    %25 = vector.broadcast %24 : vector<1x128xf32> to vector<8x128xf32>
    %26 = arith.addf %23, %25 : vector<8x128xf32>
    %c0_15 = arith.constant 0 : index
    %c0_16 = arith.constant 0 : index
    %27 = vector.load %arg7[%c0_15, %c0_16] : memref<8x128xf32, #tpu.memory_space<vmem>>, vector<8x128xf32>
    tpu.vector_store %arg7[%c0_15, %c0_16], %26 {strides = array<i32>} : memref<8x128xf32, #tpu.memory_space<vmem>>, vector<8x128xf32>,
    return
  }
  func.func @transform_0(%arg0: i32, %arg1: i32) -> (i32, i32) {
    %c0_i32 = arith.constant 0 : i32
    %c0_i32_0 = arith.constant 0 : i32
    return %arg0, %c0_i32 : i32, i32
  }
  func.func @transform_1(%arg0: i32, %arg1: i32) -> (i32, i32) {
    %c0_i32 = arith.constant 0 : i32
    %c0_i32_0 = arith.constant 0 : i32
    return %c0_i32, %arg1 : i32, i32
  }
  func.func @transform_2(%arg0: i32, %arg1: i32) -> (i32, i32) {
    %c0_i32 = arith.constant 0 : i32
    %c0_i32_0 = arith.constant 0 : i32
    return %c0_i32, %arg1 : i32, i32
  }
  func.func @transform_3(%arg0: i32, %arg1: i32) -> (i32, i32) {
    %c0_i32 = arith.constant 0 : i32
    %c0_i32_0 = arith.constant 0 : i32
    return %arg1, %c0_i32 : i32, i32
  }
  func.func @transform_4(%arg0: i32, %arg1: i32) -> (i32, i32) {
    %c0_i32 = arith.constant 0 : i32
    %c0_i32_0 = arith.constant 0 : i32
    %c0_i32_1 = arith.constant 0 : i32
    return %c0_i32, %c0_i32_0 : i32, i32
  }
  func.func @transform_5(%arg0: i32, %arg1: i32) -> (i32, i32) {
    %c0_i32 = arith.constant 0 : i32
    %c0_i32_0 = arith.constant 0 : i32
    return %arg0, %c0_i32 : i32, i32
  }
}

</mosaic_0001>

<bundles_post_ra>
// kernel: tpu_custom_call.1
= control target key start
LH: loop header
LB: loop body
LE: loop exit
PB: predicated region body
PF: predicated region fallthrough
CT: control target
= control target key end

     0   :  { %10 = vsyncpa [#allocation3], 0  ;;  %s1348_s0 = inlined_call_operand.hbm [shape: f32[16,128], index: 0, kind: input, shape index: {}]   ;;  %s1349_s1 = inlined_call_operand.hbm [shape: bf16[128,128], index: 1, kind: input, shape index: {}]   ;;  %s1350_s2 = inlined_call_operand.vmem [shape: f32[1,128], index: 2, kind: input, shape index: {}]   ;;  %s1351_s3 = inlined_call_operand.hbm [shape: bf16[128,128], index: 3, kind: input, shape index: {}]   ;;  %s1352_s4 = inlined_call_operand.vmem [shape: f32[1,128], index: 4, kind: input, shape index: {}]   ;;  %s1353_s5 = inlined_call_operand.hbm [shape: f32[16,128], index: 5, kind: output, shape index: {}]  }
   0x1   :  { %12 = vsyncpa [#allocation3 + $0x1], 0 }
   0x2   :  { %13 = vsyncpa [#allocation6], 0 }
   0x3   :  { %14 = vsyncpa [#allocation4], 0 }
   0x4   :  { %16 = vsyncpa [#allocation4 + $0x1], 0  ;;  %s1085_s18 = smov 0   ;;  %s1087_s19 = smov 0  }
   0x5   :  { %s1089_s20 = smov 0   ;;  %s1091_s21 = smov 0  }
   0x6   :  { %s1093_s22 = smov 0   ;;  %s1095_s23 = smov 0  }
   0x7 LB: > { %s674_s24 = sadd.s32 4294967295, %s1045_s23   ;;  %s675_s25 = sadd.s32 4294967294, %s1045_s23   ;;  %s1045_s23 = sphi %s1095_s23, %s22_s23   ;;  %s1041_s22 = sphi %s1093_s22, %s1375_s22   ;;  %s1037_s21 = sphi %s1091_s21, %s1374_s21   ;;  %s1033_s20 = sphi %s1089_s20, %s1373_s20   ;;  %s1029_s19 = sphi %s1087_s19, %s1372_s19   ;;  %s1025_s18 = sphi %s1085_s18, %s1371_s18  }
   0x8   : > { %p54_p0 = scmp.ne.s32.totalorder %s1029_s19, %s1025_s18  ;;  %p1119_p1 = scmp.eq.s32.totalorder %s674_s24, 0 }
   0x9   : > { %p1123_p2 = scmp.eq.s32.totalorder %s674_s24, 1  ;;  %p183_p3 = scmp.eq.s32.totalorder %s675_s25, 1 }
   0xa   : > { %s1358_s26 = scalar_select %p1119_p1, 1, 0 }
   0xb   : > { %p1129_p4 = por %p1119_p1, %p54_p0  ;;  %p676_p5 = scmp.ge.s32.totalorder %s1045_s23, 1 }
   0xc   : > { %p1134_p6 = por %p183_p3, %p54_p0  ;;  %p190_p7 = scmp.lt.s32.totalorder %s1045_s23, 3 }
   0xd   : > { %s1360_s28 = scalar_select %p1129_p4, 1, 0 }
   0xe   : > { %s1361_s29 = scalar_select %p1134_p6, 1, 0 }
   0xf   : > { %p1139_p8 = pnand %p676_p5, %p190_p7  ;;  %s1047_s6 = smov [#allocation5]  }
  0x10   : > { %s204_s7 = sshll.u32 %s1047_s6, 4  ;;  %s1048_s9 = smov [#allocation7]   ;;  %s1143_s7 = int_to_ptr.vmem [resolvable:$true] %s204_s7 }
  0x11   : > { %p780_p9 = pneg %p1139_p8  ;;  %s226_s10 = sshll.u32 %s1048_s9, 4  ;;  %s1154_s10 = int_to_ptr.vmem [resolvable:$true] %s226_s10 }
  0x12   : > { %s873_s13 = scalar_lea.hbm %s1349_s1, 1024 }
  0x13   : > { %p1150_p11 = pnand %p780_p9, %p1119_p1  ;;  %p874_p12 = scmp.ne.s32.totalorder %s1349_s1, %s873_s13 }
  0x14   : > { %p880_p5 = scmp.lt.u32.totalorder %s873_s13, %s1349_s1 }
  0x15   : > { %p875_p13 = pneg %p1150_p11 }
  0x17   : > { %p876_p0 = pnand %p875_p13, %p874_p12 }
  0x19   : > { %p877_p3 = pneg %p876_p0 }
  0x1b   : > { %p882_p7 = pnand %p880_p5, %p877_p3 }
  0x1d   : > { %885 = shalt.err (!%p882_p7)
}
  0x1e   : > { %s886_s24 = scalar_lea.vmem %s1143_s7, 1024  ;;  %p894_p1 = scmp.lt.s32.totalorder %s1143_s7, %s1143_s7 }
  0x1f   : > { %p887_p9 = scmp.ne.s32.totalorder %s1143_s7, %s886_s24  ;;  %p895_p12 = scmp.lt.s32.totalorder %s886_s24, %s886_s24 }
  0x21   : > { %p889_p10 = pnand %p887_p9, %p875_p13  ;;  %p896_p0 = por %p895_p12, %p894_p1 }
  0x23   : > { %p890_p6 = pneg %p889_p10 }
  0x25   : > { %p897_p4 = pnand %p896_p0, %p890_p6 }
  0x27   : > { %900 = shalt.err (!%p897_p4)
}
  0x28   : > { %s1049_s25 = smov 64   ;;  %s1050_s6 = smov 4  }
  0x29   : > { %783 = dma.hbm_to_vmem [thread:$0]  (!%p1150_p11), %s1349_s1, 1024, %s1143_s7, [#allocation6], %s1049_s25, %s1049_s25, %s1050_s6  }
  0x2a   : > { %s901_s14 = scalar_lea.hbm %s1351_s3, 1024 }
  0x2b   : > { %p902_p1 = scmp.ne.s32.totalorder %s1351_s3, %s901_s14  ;;  %p908_p10 = scmp.lt.u32.totalorder %s901_s14, %s1351_s3 }
  0x2d   : > { %p904_p4 = pnand %p902_p1, %p875_p13 }
  0x2f   : > { %p905_p6 = pneg %p904_p4 }
  0x31   : > { %p910_p3 = pnand %p908_p10, %p905_p6 }
  0x33   : > { %913 = shalt.err (!%p910_p3)
}
  0x34   : > { %s914_s7 = scalar_lea.vmem %s1154_s10, 1024  ;;  %p922_p12 = scmp.lt.s32.totalorder %s1154_s10, %s1154_s10 }
  0x35   : > { %p915_p5 = scmp.ne.s32.totalorder %s1154_s10, %s914_s7  ;;  %p923_p0 = scmp.lt.s32.totalorder %s914_s7, %s914_s7 }
  0x37   : > { %p917_p7 = pnand %p915_p5, %p875_p13  ;;  %p924_p1 = por %p923_p0, %p922_p12 }
  0x39   : > { %p918_p9 = pneg %p917_p7 }
  0x3b   : > { %p925_p4 = pnand %p924_p1, %p918_p9 }
  0x3d   : > { %928 = shalt.err (!%p925_p4)
}
  0x3e   : > { %786 = dma.hbm_to_vmem [thread:$0]  (!%p1150_p11), %s1351_s3, 1024, %s1154_s10, [#allocation6], %s1049_s25, %s1049_s25, %s1050_s6  }
  0x3f   : > { %s34_s12 = sadd.s32 1, %s1041_s22  ;;  %s41_s13 = sadd.s32 1, %s1033_s20 }
  0x40   : > { %p36_p13 = scmp.ge.s32.totalorder %s34_s12, 2  ;;  %p48_p6 = scmp.ne.s32.totalorder %s1033_s20, %s1029_s19 }
  0x41   : > { %p49_p10 = scmp.eq.s32.totalorder %s1045_s23, 0  ;;  %p797_p3 = scmp.lt.s32.totalorder %s1045_s23, 2 }
  0x42   : > { %s1377_s12 = smov (%p36_p13, %s34_s12), 0  ;;  %p1218_p7 = por %p1123_p2, %p48_p6 }
  0x43   : > { %p50_p5 = por %p49_p10, %p48_p6  ;;  %s38_s14 = ssub.s32 %s1041_s22, %s1377_s12 }
  0x44   : > { %s1364_s8 = scalar_select %p1218_p7, 1, 0 }
  0x45   : > { %s243_s15 = sand.u32 1, %s1033_s20   ;;  %p39_p9 = scmp.eq.s32.totalorder %s38_s14, 0 }
  0x46   : > { %s681_s10 = sshll.u32 %s243_s15, 3  ;;  %s682_s25 = sshll.u32 %s1041_s22, 7 }
  0x47   : > { %s1227_s6 = scalar_select %p39_p9, %s1033_s20, %s41_s13  }
  0x48   : > { %s1232_s24 = scalar_lea.hbm %s1348_s0, %s682_s25  ;;  %s247_s27 = scalar_lea.vmem [#allocation2], %s681_s10 }
  0x49   : > { %s254_s7 = sshll.u32 %s247_s27, 4  ;;  %p1236_p2 = pnand %p797_p3, %p50_p5  ;;  %s1240_s7 = int_to_ptr.vmem [resolvable:$true] %s254_s7 }
  0x4a   : > { %s244_s11 = scalar_lea.sflag [#allocation3], %s243_s15  ;;  %s929_s13 = scalar_lea.hbm %s1232_s24, 128 }
  0x4b   : > { %p930_p11 = scmp.ne.s32.totalorder %s1232_s24, %s929_s13  ;;  %p931_p12 = pneg %p1236_p2 }
  0x4c   : > { %s934_s25 = scalar_lea.hbm %s1348_s0, 256  ;;  %p935_p4 = scmp.lt.u32.totalorder %s1232_s24, %s1348_s0 }
  0x4d   : > { %p932_p0 = pnand %p931_p12, %p930_p11  ;;  %p936_p13 = scmp.lt.u32.totalorder %s934_s25, %s929_s13 }
  0x4e   : > { %p938_p10 = scmp.lt.u32.totalorder %s929_s13, %s1232_s24 }
  0x4f   : > { %p933_p1 = pneg %p932_p0  ;;  %p937_p6 = por %p936_p13, %p935_p4 }
  0x51   : > { %p939_p3 = por %p938_p10, %p937_p6 }
  0x53   : > { %p940_p5 = pnand %p939_p3, %p933_p1 }
  0x55   : > { %943 = shalt.err (!%p940_p5)
}
  0x56   : > { %s944_s15 = scalar_lea.vmem %s1240_s7, 128  ;;  %s1051_s27 = smov [#allocation2]  }
  0x57   : > { %p945_p9 = scmp.ne.s32.totalorder %s1240_s7, %s944_s15  ;;  %s949_s14 = sshll.u32 %s1051_s27, 4  ;;  %s950_s14 = int_to_ptr.vmem [resolvable:$false] %s949_s14 }
  0x58   : > { %s951_s10 = scalar_lea.vmem %s950_s14, 256  ;;  %p952_p7 = scmp.lt.s32.totalorder %s1240_s7, %s950_s14 }
  0x59   : > { %p947_p11 = pnand %p945_p9, %p931_p12  ;;  %p953_p4 = scmp.lt.s32.totalorder %s951_s10, %s944_s15 }
  0x5b   : > { %p948_p0 = pneg %p947_p11  ;;  %p954_p13 = por %p953_p4, %p952_p7 }
  0x5d   : > { %p955_p6 = pnand %p954_p13, %p948_p0 }
  0x5f   : > { %958 = shalt.err (!%p955_p6)
}
  0x60   : > { %790 = dma.hbm_to_vmem [thread:$0]  (!%p1236_p2), %s1232_s24, 128, %s1240_s7, %s244_s11  }
  0x61   : > { %263 = sbr.rel (%p1139_p8) target bundleno = 611 (0x263), region = 40  ;;  %s1270_s13 = sand.u32 (!%p1139_p8), 1, %s1029_s19  }
  0x62   : > { %s684_s25 = sshll.u32 (!%p1139_p8), %s1270_s13, 3  ;;  %s266_s16 = scalar_lea.sflag (!%p1139_p8), [#allocation3], %s1270_s13 }
  0x63   : > { %s1276_s17 = scalar_lea.vmem (!%p1139_p8), [#allocation2], %s684_s25  ;;  %p1366_p7 = scmp.ne.s32.totalorder (!%p1139_p8), %s1360_s28, 0 }
  0x68   : > { %1012 = dma.done.wait (%p1366_p7), %s266_s16, 128  }
  0x69   : > { %1014 = vsyncadd (%p1366_p7), %s266_s16, 4294967168  ;;  %p1367_p2 = scmp.ne.s32.totalorder %s1358_s26, 0 }
  0x6b   : > { %1016 = dma.done.wait (%p1367_p2), [#allocation6], 2048  }
  0x6c   : > { %1018 = vsyncadd (%p1367_p2), [#allocation6], 4294965248  ;;  %v1052_v0 = vmov 0.0   ;;  %vm1053_vm0 = vmmov 0   ;;  %v855_v1 = vld [vmem:[#allocation5] sm:$0xff]   ;;  %v856_v2 = vld [vmem:[#allocation5 + $0x8] sm:$0xff]  }
  0x6d   : > { %728 = vmatprep.subr.bf16.mxu0 %v1052_v0  ;;  %744 = vmatprep.mubr.msk.bf16.mxu0 %vm1053_vm0, %v1052_v0  ;;  %v857_v3 = vld [vmem:[#allocation5 + $0x10] sm:$0xff]   ;;  %v858_v4 = vld [vmem:[#allocation5 + $0x18] sm:$0xff]   ;;  %v863_v5 = vld [vmem:[#allocation7] sm:$0xff]   ;;  %s707_s7 = sshll.u32 %s1037_s21, 7  ;;  %s306_s9 = scalar_lea.vmem [#allocation8], %s684_s25 }
  0x6e   : > { %748 = vmatprep.subr.bf16.mxu1 %v1052_v0  ;;  %764 = vmatprep.mubr.msk.bf16.mxu1 %vm1053_vm0, %v1052_v0  ;;  %v859_v6 = vld [vmem:[#allocation5 + $0x20] sm:$0xff]   ;;  %v860_v7 = vld [vmem:[#allocation5 + $0x28] sm:$0xff]   ;;  %v861_v8 = vld [vmem:[#allocation5 + $0x30] sm:$0xff]   ;;  %s561_s11 = sshll.u32 %s306_s9, 4  ;;  %s1299_s14 = scalar_lea.hbm %s1353_s5, %s707_s7  ;;  %s1301_s11 = int_to_ptr.vmem [resolvable:$true] %s561_s11 }
  0x6f   : > { %729 = vmatpush3.bf16.msra.mxu0 %v855_v1  ;;  %749 = vmatpush3.bf16.msra.mxu1 %v863_v5  ;;  %v862_v9 = vld [vmem:[#allocation5 + $0x38] sm:$0xff]   ;;  %v864_v12 = vld [vmem:[#allocation7 + $0x8] sm:$0xff]   ;;  %v865_v13 = vld [vmem:[#allocation7 + $0x10] sm:$0xff]   ;;  %s548_s21 = scalar_lea.sflag [#allocation4], %s1270_s13  ;;  %s959_s10 = scalar_lea.vmem %s1301_s11, 128 }
  0x70   : > { %730 = vmatprep.subr.bf16.mxu0 %v1052_v0  ;;  %750 = vmatprep.subr.bf16.mxu1 %v1052_v0  ;;  %v312_v10 = vld [vmem:[%s1276_s17] sm:$0xff]  ;;  %v867_v15 = vld [vmem:[#allocation7 + $0x20] sm:$0xff]   ;;  %v868_v16 = vld [vmem:[#allocation7 + $0x28] sm:$0xff]   ;;  %p960_p8 = scmp.ne.s32.totalorder %s1301_s11, %s959_s10  ;;  %p1368_p12 = scmp.ne.s32.totalorder %s1364_s8, 0 }
  0x71   : > { %v313_v11 = vpack.c.bf16 %v312_v10, %v312_v10  ;;  %v866_v14 = vld [vmem:[#allocation7 + $0x18] sm:$0xff]   ;;  %v869_v17 = vld [vmem:[#allocation7 + $0x30] sm:$0xff]   ;;  %s1054_s25 = smov [#allocation8]  }
  0x72   : > { %v870_v18 = vld [vmem:[#allocation7 + $0x38] sm:$0xff]   ;;  %v688_v19 = vld [vmem:[%s1350_s2] ss:$0 sm:$0xff]  ;;  %p961_p1 = pnand %p960_p8, %p1368_p12  ;;  %s963_s16 = sshll.u32 %s1054_s25, 4  ;;  %s964_s16 = int_to_ptr.vmem [resolvable:$false] %s963_s16 }
  0x73   : > { %731 = vmatpush3.bf16.msra.mxu0 %v856_v2  ;;  %751 = vmatpush3.bf16.msra.mxu1 %v864_v12  ;;  %v697_v35 = vld [vmem:[%s1352_s4] ss:$0 sm:$0xff]  ;;  %s965_s17 = scalar_lea.vmem %s964_s16, 256  ;;  %p966_p3 = scmp.lt.s32.totalorder %s1301_s11, %s964_s16 }
  0x74   : > { %732 = vmatprep.subr.bf16.mxu0 %v1052_v0  ;;  %752 = vmatprep.subr.bf16.mxu1 %v1052_v0  ;;  %p962_p10 = pneg %p961_p1  ;;  %p967_p5 = scmp.lt.s32.totalorder %s965_s17, %s959_s10 }
  0x76   : > { %p968_p9 = por %p967_p5, %p966_p3 }
  0x77   : > { %733 = vmatpush3.bf16.msra.mxu0 %v857_v3  ;;  %753 = vmatpush3.bf16.msra.mxu1 %v865_v13 }
  0x78   : > { %734 = vmatprep.subr.bf16.mxu0 %v1052_v0  ;;  %754 = vmatprep.subr.bf16.mxu1 %v1052_v0  ;;  %p969_p11 = pnand %p968_p9, %p962_p10 }
  0x7b   : > { %735 = vmatpush3.bf16.msra.mxu0 %v858_v4  ;;  %755 = vmatpush3.bf16.msra.mxu1 %v866_v14 }
  0x7c   : > { %736 = vmatprep.subr.bf16.mxu0 %v1052_v0  ;;  %756 = vmatprep.subr.bf16.mxu1 %v1052_v0 }
  0x7f   : > { %737 = vmatpush3.bf16.msra.mxu0 %v859_v6  ;;  %757 = vmatpush3.bf16.msra.mxu1 %v867_v15 }
  0x80   : > { %738 = vmatprep.subr.bf16.mxu0 %v1052_v0  ;;  %758 = vmatprep.subr.bf16.mxu1 %v1052_v0 }
  0x83   : > { %739 = vmatpush3.bf16.msra.mxu0 %v860_v7  ;;  %759 = vmatpush3.bf16.msra.mxu1 %v868_v16 }
  0x84   : > { %740 = vmatprep.subr.bf16.mxu0 %v1052_v0  ;;  %760 = vmatprep.subr.bf16.mxu1 %v1052_v0 }
  0x87   : > { %741 = vmatpush3.bf16.msra.mxu0 %v861_v8  ;;  %761 = vmatpush3.bf16.msra.mxu1 %v869_v17 }
  0x88   : > { %742 = vmatprep.subr.bf16.mxu0 %v1052_v0  ;;  %762 = vmatprep.subr.bf16.mxu1 %v1052_v0 }
  0x8b   : > { %743 = vmatpush3.bf16.msra.mxu0 %v862_v9  ;;  %763 = vmatpush3.bf16.msra.mxu1 %v870_v18 }
  0x8e   : > { %745 = vmatmul.mubr.bf16.vlgmr.msra.gmra.mrb[0].mxu0 %v313_v11 }
 0x161   : > { %v419_v20 = vpop.f32.mrb[0].mxu0 }
 0x162   : > { %v420_v21 = vadd.f32 %v688_v19, %v419_v20  ;;  %v746_v22 = vpop.f32.mrb[1].mxu0 }
 0x163   : > { %v422_v23 = vpop.f32.mrb[2].mxu0 }
 0x164   : > { %v425_v24 = vmul.f32 %v420_v21, %v420_v21  ;;  %v747_v25 = vpop.f32.mrb[3].mxu0  ;;  %v426_v27 = vmul.f32 0.7978846, %v420_v21 }
 0x166   : > { %v427_v26 = vmul.f32 0.044715, %v425_v24 }
 0x168   : > { %v428_v28 = vadd.f32 1.0, %v427_v26 }
 0x16a   : > { %v429_v29 = vmul.f32 %v428_v28, %v426_v27 }
 0x16c   : > { %871 = vtanh.f32 %v429_v29 }
 0x176   : > { %v872_v30 = vpop.eup %871 }
 0x177   : > { %v431_v31 = vmul.f32 0.5, %v872_v30 }
 0x179   : > { %v432_v32 = vadd.f32 0.5, %v431_v31 }
 0x17b   : > { %v433_v33 = vmul.f32 %v432_v32, %v420_v21 }
 0x17d   : > { %v434_v34 = vpack.c.bf16 %v433_v33, %v433_v33 }
 0x17f   : > { %765 = vmatmul.mubr.bf16.vlgmr.msra.gmra.mrb[0].mxu1 %v434_v34 }
 0x252   : > { %v540_v36 = vpop.f32.mrb[0].mxu1 }
 0x253   : > { %v541_v37 = vadd.f32 %v697_v35, %v540_v36  ;;  %v766_v38 = vpop.f32.mrb[1].mxu1 }
 0x254   : > { %v543_v39 = vpop.f32.mrb[2].mxu1 }
 0x255   : > { %546 = vst [vmem:[%s306_s9] sm:$0xff] %v541_v37  ;;  %v767_v40 = vpop.f32.mrb[3].mxu1 }
 0x256   : > { %972 = shalt.err (!%p969_p11)
}
 0x257   : > { %s973_s13 = scalar_lea.hbm %s1299_s14, 128  ;;  %s977_s30 = scalar_lea.hbm %s1353_s5, 256 }
 0x258   : > { %p974_p0 = scmp.ne.s32.totalorder %s1299_s14, %s973_s13  ;;  %p978_p6 = scmp.lt.u32.totalorder %s1299_s14, %s1353_s5 }
 0x259   : > { %p979_p7 = scmp.lt.u32.totalorder %s977_s30, %s973_s13  ;;  %p981_p8 = scmp.lt.u32.totalorder %s973_s13, %s1299_s14 }
 0x25a   : > { %p975_p4 = pnand %p974_p0, %p1368_p12 }
 0x25b   : > { %p980_p2 = por %p979_p7, %p978_p6 }
 0x25c   : > { %p976_p13 = pneg %p975_p4 }
 0x25d   : > { %p982_p1 = por %p981_p8, %p980_p2 }
 0x25f   : > { %p983_p10 = pnand %p982_p1, %p976_p13 }
 0x261   : > { %986 = shalt.err (!%p983_p10)
}
 0x262   : > { %778 = dma.vmem_to_hbm [thread:$0]  (%p1368_p12), %s1301_s11, 128, %s1299_s14, %s548_s21  }
 0x263 PF: > { %s573_s9 = sand.u32 1, %s1025_s18   ;;  %p1369_p3 = scmp.ne.s32.totalorder %s1361_s29, 0 }
 0x264   : > { %p1370_p5 = scmp.ge.s32.totalorder %s1045_s23, 2  ;;  %s574_s15 = scalar_lea.sflag [#allocation4], %s573_s9 }
 0x266   : > { %p792_p9 = pnand %p1370_p5, %p1369_p3 }
 0x268   : > { %1020 = dma.done.wait (!%p792_p9), %s574_s15, 128  }
 0x269   : > { %1022 = vsyncadd (!%p792_p9), %s574_s15, 4294967168  ;;  %s22_s23 = sadd.s32 1, %s1045_s23   ;;  %s1371_s18 = smov %s1029_s19 }
 0x26a   : > { %p19_p11 = scmp.ge.s32.totalorder %s22_s23, 4   ;;  %s1372_s19 = smov %s1033_s20 }
 0x26b   : > { %s1373_s20 = smov %s1227_s6  ;;  %s1374_s21 = smov %s1041_s22 }
 0x26c   : > { %s1375_s22 = smov %s1377_s12  ;;  %21 = sbr.rel (!%p19_p11) target bundleno = 7 (0x7), region = 98 }
 0x273   :  { %579 = vsyncpa [#allocation3], 1 }
 0x274   :  { %581 = vsyncpa [#allocation3 + $0x1], 1 }
 0x275   :  { %582 = vsyncpa [#allocation6], 1 }
 0x276   :  { %583 = vsyncpa [#allocation4], 1 }
 0x277   :  { %585 = vsyncpa [#allocation4 + $0x1], 1 }

</bundles_post_ra>
